<compile_context>
chip_gen: v7x
topology: tpu7x:2x2x1
jax: 0.10.0
libtpu: 0.0.40
codegen_flags: <defaults>
</compile_context>

<pallas_src>
import functools
import numpy as np
import jax
import jax.numpy as jnp
from jax import lax
from jax.experimental import pallas as pl
from jax.experimental.pallas import tpu as pltpu

# ---------------- problem sizes (small, deterministic) ----------------
D_MODEL = 32
NHEAD = 4
DH = D_MODEL // NHEAD
L_TGT = 8
L_MEM = 16
BATCH = 2
EPS = 1e-5

_NT_DIMS = (((1,), (1,)), ((), ()))   # A @ B^T (contract last dims)


# ---------------------------- Pallas kernel ----------------------------
def cross_attn_kernel(seq_t_ref, seq_m_ref, w_ref, vec_ref, out_ref,
                      s_scratch, attn_scratch,
                      *, batch, nhead, l_tgt, l_mem, eps):
    d = out_ref.shape[-1]
    dh = d // nhead
    nt = batch * l_tgt
    nm = batch * l_mem

    # Stacked inputs: [tgt ; query_pos] and [memory ; pos] (row slices, cheap).
    tgt = seq_t_ref[:nt, :].astype(jnp.float32)            # (B*Lt, D)
    qpos = seq_t_ref[nt:, :].astype(jnp.float32)
    mem = seq_m_ref[:nm, :].astype(jnp.float32)             # (B*Lm, D)
    pos = seq_m_ref[nm:, :].astype(jnp.float32)

    q_in = tgt + qpos
    k_in = mem + pos

    # Weight slab [Wq^T*scale ; Wk^T ; Wv^T ; Wo^T] and vector slab
    # [bq*scale ; bk ; bv ; bo ; gamma ; beta ; 0 ; 0] (static row offsets).
    w = w_ref[...]
    vec = vec_ref[...]
    bq, bk, bv = vec[0:1, :], vec[1:2, :], vec[2:3, :]
    bo, gamma, beta = vec[3:4, :], vec[4:5, :], vec[5:6, :]

    # Fused Q/K/V projections over all batches (one MXU call each).
    q = jnp.dot(q_in, w[0:d, :], preferred_element_type=jnp.float32) + bq
    k = jnp.dot(k_in, w[d:2 * d, :], preferred_element_type=jnp.float32) + bk
    v = jnp.dot(mem, w[2 * d:3 * d, :], preferred_element_type=jnp.float32) + bv
    wot = w[3 * d:4 * d, :]                                  # (D, D) = W_o^T

    # Per-head lane windows taken ONCE (not re-sliced inside the (b,h) loop).
    q_h = [q[:, h * dh:(h + 1) * dh] for h in range(nhead)]  # each (B*Lt, dh)
    k_h = [k[:, h * dh:(h + 1) * dh] for h in range(nhead)]  # each (B*Lm, dh)
    v_h = [v[:, h * dh:(h + 1) * dh] for h in range(nhead)]

    # ---- Phase 1: all (b,h) score tiles -> one scratch, one fused softmax ----
    for h in range(nhead):                                   # static unroll
        for b in range(batch):
            idx = h * batch + b
            s_tile = lax.dot_general(
                q_h[h][b * l_tgt:(b + 1) * l_tgt],            # sublane slice
                k_h[h][b * l_mem:(b + 1) * l_mem],
                _NT_DIMS, preferred_element_type=jnp.float32)  # (Lt, Lm)
            s_scratch[idx * l_tgt:(idx + 1) * l_tgt, :] = s_tile

    s = s_scratch[...]                                        # (B*H*Lt, Lm)
    s = s - jnp.max(s, axis=-1, keepdims=True)
    p = jnp.exp(s)
    p = p / jnp.sum(p, axis=-1, keepdims=True)                # exact (EUP slack)

    # ---- Phase 2: P @ V per (b,h), assembled, then ONE output projection ----
    for h in range(nhead):
        for b in range(batch):
            idx = h * batch + b
            oh = jnp.dot(p[idx * l_tgt:(idx + 1) * l_tgt, :],
                         v_h[h][b * l_mem:(b + 1) * l_mem],
                         preferred_element_type=jnp.float32)   # (Lt, dh)
            attn_scratch[b * l_tgt:(b + 1) * l_tgt, h * dh:(h + 1) * dh] = oh

    o = jnp.dot(attn_scratch[...], wot, preferred_element_type=jnp.float32)

    # residual (dropout = 0) + output-projection bias + LayerNorm
    x = tgt + o + bo
    mu = jnp.mean(x, axis=-1, keepdims=True)
    var = jnp.mean((x - mu) ** 2, axis=-1, keepdims=True)
    xn = (x - mu) * lax.rsqrt(var + eps)
    out_ref[...] = (xn * gamma + beta).astype(out_ref.dtype)


# ------------------------------ wrapper --------------------------------
@jax.jit
def cross_attention_layer(tgt, memory, pos, query_pos, params):
    """tgt/query_pos: (Lt, B, D); memory/pos: (Lm, B, D) — seq-first like PyTorch."""
    Lt, B, D = tgt.shape
    Lm = memory.shape[0]
    dh = D // NHEAD
    scale = 1.0 / (dh ** 0.5)

    # seq-first -> batch-major, flattened 2D; stack to cut DMA descriptor count.
    tgt2 = jnp.transpose(tgt, (1, 0, 2)).reshape(B * Lt, D)
    qpos2 = jnp.transpose(query_pos, (1, 0, 2)).reshape(B * Lt, D)
    mem2 = jnp.transpose(memory, (1, 0, 2)).reshape(B * Lm, D)
    pos2 = jnp.transpose(pos, (1, 0, 2)).reshape(B * Lm, D)
    seq_t = jnp.concatenate([tgt2, qpos2], axis=0)            # (2*B*Lt, D)
    seq_m = jnp.concatenate([mem2, pos2], axis=0)             # (2*B*Lm, D)

    # One weight slab and one vector slab (scale folded into Wq^T / bq).
    w_slab = jnp.concatenate([params["wq"].T * scale,
                              params["wk"].T,
                              params["wv"].T,
                              params["wo"].T], axis=0)        # (4D, D)
    vec_slab = jnp.concatenate([params["bq"] * scale, params["bk"], params["bv"],
                                params["bo"], params["gamma"], params["beta"],
                                jnp.zeros((2, D), jnp.float32)], axis=0)  # (8, D)

    vmem_spec = pl.BlockSpec(memory_space=pltpu.MemorySpace.VMEM)
    kernel = functools.partial(cross_attn_kernel, batch=B, nhead=NHEAD,
                               l_tgt=Lt, l_mem=Lm, eps=EPS)

    # No grid: single-shot kernel, whole arrays resident in VMEM (no pipeline).
    out2 = pl.pallas_call(
        kernel,
        out_shape=jax.ShapeDtypeStruct((B * Lt, D), tgt.dtype),
        in_specs=[vmem_spec, vmem_spec, vmem_spec, vmem_spec],
        out_specs=vmem_spec,
        scratch_shapes=[
            pltpu.VMEM((B * NHEAD * Lt, Lm), jnp.float32),   # score tiles
            pltpu.VMEM((B * Lt, D), jnp.float32),            # assembled attn out
        ],
    )(seq_t, seq_m, w_slab, vec_slab)

    # batch-major 2D -> seq-first (Lt, B, D)
    return jnp.transpose(out2.reshape(B, Lt, D), (1, 0, 2))


# ------------------------- pure-JAX reference ---------------------------
def reference(tgt, memory, pos, query_pos, params):
    q_in = tgt + query_pos
    k_in = memory + pos
    v_in = memory
    q = jnp.einsum("lbd,ed->lbe", q_in, params["wq"]) + params["bq"][0]
    k = jnp.einsum("lbd,ed->lbe", k_in, params["wk"]) + params["bk"][0]
    v = jnp.einsum("lbd,ed->lbe", v_in, params["wv"]) + params["bv"][0]

    def split(x):  # (L, B, D) -> (B, H, L, Dh)
        L, B, _ = x.shape
        return jnp.transpose(x.reshape(L, B, NHEAD, DH), (1, 2, 0, 3))

    qh, kh, vh = split(q), split(k), split(v)
    s = jnp.einsum("bhqd,bhkd->bhqk", qh, kh) / (DH ** 0.5)
    p = jax.nn.softmax(s, axis=-1)
    o = jnp.einsum("bhqk,bhkd->bhqd", p, vh)                 # (B, H, Lt, Dh)
    o = jnp.transpose(o, (2, 0, 1, 3)).reshape(tgt.shape)     # (Lt, B, D)
    o = jnp.einsum("lbd,ed->lbe", o, params["wo"]) + params["bo"][0]
    x = tgt + o
    mu = jnp.mean(x, axis=-1, keepdims=True)
    var = jnp.mean((x - mu) ** 2, axis=-1, keepdims=True)
    return (x - mu) / jnp.sqrt(var + EPS) * params["gamma"][0] + params["beta"][0]


# ------------------------------- main -----------------------------------
def xavier_uniform(key, shape):
    fan_out, fan_in = shape
    bound = (6.0 / (fan_in + fan_out)) ** 0.5
    return jax.random.uniform(key, shape, jnp.float32, -bound, bound)


if __name__ == "__main__":
    key = jax.random.PRNGKey(0)
    k_inproj, k_out, k_tgt, k_mem, k_pos, k_qpos = jax.random.split(key, 6)

    # parameters mirroring the module's shapes/init:
    #   in_proj_weight (3D, D) xavier, in_proj_bias zeros,
    #   out_proj (D, D) xavier, out bias zeros, LayerNorm gamma=1 beta=0.
    in_proj = xavier_uniform(k_inproj, (3 * D_MODEL, D_MODEL))
    params = {
        "wq": in_proj[:D_MODEL],
        "wk": in_proj[D_MODEL:2 * D_MODEL],
        "wv": in_proj[2 * D_MODEL:],
        "bq": jnp.zeros((1, D_MODEL), jnp.float32),
        "bk": jnp.zeros((1, D_MODEL), jnp.float32),
        "bv": jnp.zeros((1, D_MODEL), jnp.float32),
        "wo": xavier_uniform(k_out, (D_MODEL, D_MODEL)),
        "bo": jnp.zeros((1, D_MODEL), jnp.float32),
        "gamma": jnp.ones((1, D_MODEL), jnp.float32),
        "beta": jnp.zeros((1, D_MODEL), jnp.float32),
    }

    # inputs: seq-first (L, B, D) like nn.MultiheadAttention defaults
    tgt = jax.random.normal(k_tgt, (L_TGT, BATCH, D_MODEL), jnp.float32)
    memory = jax.random.normal(k_mem, (L_MEM, BATCH, D_MODEL), jnp.float32)
    pos = jax.random.normal(k_pos, (L_MEM, BATCH, D_MODEL), jnp.float32)
    query_pos = jax.random.normal(k_qpos, (L_TGT, BATCH, D_MODEL), jnp.float32)

    out = cross_attention_layer(tgt, memory, pos, query_pos, params)
    out = jax.block_until_ready(out)

    ref = reference(tgt, memory, pos, query_pos, params)
    assert out.shape == (L_TGT, BATCH, D_MODEL)
    np.testing.assert_allclose(np.asarray(out), np.asarray(ref),
                               rtol=1e-4, atol=1e-4)
    print("KERNEL_OK")
</pallas_src>

<mosaic_0001>
module attributes {stable_mosaic.version = 11 : i64} {
  func.func @cross_attn_kernel(%arg0: memref<32x32xf32, #tpu.memory_space<vmem>>, %arg1: memref<64x32xf32, #tpu.memory_space<vmem>>, %arg2: memref<128x32xf32, #tpu.memory_space<vmem>>, %arg3: memref<8x32xf32, #tpu.memory_space<vmem>>, %arg4: memref<16x32xf32, #tpu.memory_space<vmem>>, %arg5: memref<64x16xf32, #tpu.memory_space<vmem>>, %arg6: memref<16x32xf32, #tpu.memory_space<vmem>>) attributes {dimension_semantics = [], scalar_prefetch = 0 : i64, scratch_operands = 2 : i64, tpu.core_type = #tpu.core_type<tc>} {
    %c0 = arith.constant 0 : index
    %c0_0 = arith.constant 0 : index
    %0 = vector.load %arg0[%c0, %c0_0] : memref<32x32xf32, #tpu.memory_space<vmem>>, vector<16x32xf32>
    %c16 = arith.constant 16 : index
    %c0_1 = arith.constant 0 : index
    %1 = vector.load %arg0[%c16, %c0_1] : memref<32x32xf32, #tpu.memory_space<vmem>>, vector<16x32xf32>
    %c0_2 = arith.constant 0 : index
    %c0_3 = arith.constant 0 : index
    %2 = vector.load %arg1[%c0_2, %c0_3] : memref<64x32xf32, #tpu.memory_space<vmem>>, vector<32x32xf32>
    %c32 = arith.constant 32 : index
    %c0_4 = arith.constant 0 : index
    %3 = vector.load %arg1[%c32, %c0_4] : memref<64x32xf32, #tpu.memory_space<vmem>>, vector<32x32xf32>
    %4 = arith.addf %0, %1 : vector<16x32xf32>
    %5 = arith.addf %2, %3 : vector<32x32xf32>
    %c0_5 = arith.constant 0 : index
    %c0_6 = arith.constant 0 : index
    %6 = vector.load %arg2[%c0_5, %c0_6] : memref<128x32xf32, #tpu.memory_space<vmem>>, vector<128x32xf32>
    %c0_7 = arith.constant 0 : index
    %c0_8 = arith.constant 0 : index
    %7 = vector.load %arg3[%c0_7, %c0_8] : memref<8x32xf32, #tpu.memory_space<vmem>>, vector<8x32xf32>
    %8 = vector.extract_strided_slice %7 {offsets = [0, 0], sizes = [1, 32], strides = [1, 1]} : vector<8x32xf32> to vector<1x32xf32>
    %9 = vector.extract_strided_slice %7 {offsets = [1, 0], sizes = [1, 32], strides = [1, 1]} : vector<8x32xf32> to vector<1x32xf32>
    %10 = vector.extract_strided_slice %7 {offsets = [2, 0], sizes = [1, 32], strides = [1, 1]} : vector<8x32xf32> to vector<1x32xf32>
    %11 = vector.extract_strided_slice %7 {offsets = [3, 0], sizes = [1, 32], strides = [1, 1]} : vector<8x32xf32> to vector<1x32xf32>
    %12 = vector.extract_strided_slice %7 {offsets = [4, 0], sizes = [1, 32], strides = [1, 1]} : vector<8x32xf32> to vector<1x32xf32>
    %13 = vector.extract_strided_slice %7 {offsets = [5, 0], sizes = [1, 32], strides = [1, 1]} : vector<8x32xf32> to vector<1x32xf32>
    %14 = vector.extract_strided_slice %6 {offsets = [0, 0], sizes = [32, 32], strides = [1, 1]} : vector<128x32xf32> to vector<32x32xf32>
    %cst = arith.constant dense<0.000000e+00> : vector<16x32xf32>
    %15 = tpu.matmul %4, %14, %cst {dimension_numbers = #tpu.dot_dimension_numbers<[1], [0], [0], [1], [0, 0, 1, 1], [], []>} : vector<16x32xf32>, vector<32x32xf32>, vector<16x32xf32> -> vector<16x32xf32>
    %16 = vector.broadcast %8 : vector<1x32xf32> to vector<16x32xf32>
    %17 = arith.addf %15, %16 : vector<16x32xf32>
    %18 = vector.extract_strided_slice %6 {offsets = [32, 0], sizes = [32, 32], strides = [1, 1]} : vector<128x32xf32> to vector<32x32xf32>
    %cst_9 = arith.constant dense<0.000000e+00> : vector<32x32xf32>
    %19 = tpu.matmul %5, %18, %cst_9 {dimension_numbers = #tpu.dot_dimension_numbers<[1], [0], [0], [1], [0, 0, 1, 1], [], []>} : vector<32x32xf32>, vector<32x32xf32>, vector<32x32xf32> -> vector<32x32xf32>
    %20 = vector.broadcast %9 : vector<1x32xf32> to vector<32x32xf32>
    %21 = arith.addf %19, %20 : vector<32x32xf32>
    %22 = vector.extract_strided_slice %6 {offsets = [64, 0], sizes = [32, 32], strides = [1, 1]} : vector<128x32xf32> to vector<32x32xf32>
    %cst_10 = arith.constant dense<0.000000e+00> : vector<32x32xf32>
    %23 = tpu.matmul %2, %22, %cst_10 {dimension_numbers = #tpu.dot_dimension_numbers<[1], [0], [0], [1], [0, 0, 1, 1], [], []>} : vector<32x32xf32>, vector<32x32xf32>, vector<32x32xf32> -> vector<32x32xf32>
    %24 = vector.broadcast %10 : vector<1x32xf32> to vector<32x32xf32>
    %25 = arith.addf %23, %24 : vector<32x32xf32>
    %26 = vector.extract_strided_slice %6 {offsets = [96, 0], sizes = [32, 32], strides = [1, 1]} : vector<128x32xf32> to vector<32x32xf32>
    %27 = vector.extract_strided_slice %17 {offsets = [0, 0], sizes = [16, 8], strides = [1, 1]} : vector<16x32xf32> to vector<16x8xf32>
    %28 = vector.extract_strided_slice %17 {offsets = [0, 8], sizes = [16, 8], strides = [1, 1]} : vector<16x32xf32> to vector<16x8xf32>
    %29 = vector.extract_strided_slice %17 {offsets = [0, 16], sizes = [16, 8], strides = [1, 1]} : vector<16x32xf32> to vector<16x8xf32>
    %30 = vector.extract_strided_slice %17 {offsets = [0, 24], sizes = [16, 8], strides = [1, 1]} : vector<16x32xf32> to vector<16x8xf32>
    %31 = vector.extract_strided_slice %21 {offsets = [0, 0], sizes = [32, 8], strides = [1, 1]} : vector<32x32xf32> to vector<32x8xf32>
    %32 = vector.extract_strided_slice %21 {offsets = [0, 8], sizes = [32, 8], strides = [1, 1]} : vector<32x32xf32> to vector<32x8xf32>
    %33 = vector.extract_strided_slice %21 {offsets = [0, 16], sizes = [32, 8], strides = [1, 1]} : vector<32x32xf32> to vector<32x8xf32>
    %34 = vector.extract_strided_slice %21 {offsets = [0, 24], sizes = [32, 8], strides = [1, 1]} : vector<32x32xf32> to vector<32x8xf32>
    %35 = vector.extract_strided_slice %25 {offsets = [0, 0], sizes = [32, 8], strides = [1, 1]} : vector<32x32xf32> to vector<32x8xf32>
    %36 = vector.extract_strided_slice %25 {offsets = [0, 8], sizes = [32, 8], strides = [1, 1]} : vector<32x32xf32> to vector<32x8xf32>
    %37 = vector.extract_strided_slice %25 {offsets = [0, 16], sizes = [32, 8], strides = [1, 1]} : vector<32x32xf32> to vector<32x8xf32>
    %38 = vector.extract_strided_slice %25 {offsets = [0, 24], sizes = [32, 8], strides = [1, 1]} : vector<32x32xf32> to vector<32x8xf32>
    %39 = vector.extract_strided_slice %27 {offsets = [0, 0], sizes = [8, 8], strides = [1, 1]} : vector<16x8xf32> to vector<8x8xf32>
    %40 = vector.extract_strided_slice %31 {offsets = [0, 0], sizes = [16, 8], strides = [1, 1]} : vector<32x8xf32> to vector<16x8xf32>
    %cst_11 = arith.constant dense<0.000000e+00> : vector<8x16xf32>
    %41 = tpu.matmul %39, %40, %cst_11 {dimension_numbers = #tpu.dot_dimension_numbers<[1], [1], [0], [0], [0, 0, 1, 0], [], []>} : vector<8x8xf32>, vector<16x8xf32>, vector<8x16xf32> -> vector<8x16xf32>
    %c0_12 = arith.constant 0 : index
    %c0_13 = arith.constant 0 : index
    %42 = vector.load %arg5[%c0_12, %c0_13] : memref<64x16xf32, #tpu.memory_space<vmem>>, vector<8x16xf32>
    tpu.vector_store %arg5[%c0_12, %c0_13], %41 {strides = array<i32>} : memref<64x16xf32, #tpu.memory_space<vmem>>, vector<8x16xf32>,
    %43 = vector.extract_strided_slice %27 {offsets = [8, 0], sizes = [8, 8], strides = [1, 1]} : vector<16x8xf32> to vector<8x8xf32>
    %44 = vector.extract_strided_slice %31 {offsets = [16, 0], sizes = [16, 8], strides = [1, 1]} : vector<32x8xf32> to vector<16x8xf32>
    %cst_14 = arith.constant dense<0.000000e+00> : vector<8x16xf32>
    %45 = tpu.matmul %43, %44, %cst_14 {dimension_numbers = #tpu.dot_dimension_numbers<[1], [1], [0], [0], [0, 0, 1, 0], [], []>} : vector<8x8xf32>, vector<16x8xf32>, vector<8x16xf32> -> vector<8x16xf32>
    %c8 = arith.constant 8 : index
    %c0_15 = arith.constant 0 : index
    %46 = vector.load %arg5[%c8, %c0_15] : memref<64x16xf32, #tpu.memory_space<vmem>>, vector<8x16xf32>
    tpu.vector_store %arg5[%c8, %c0_15], %45 {strides = array<i32>} : memref<64x16xf32, #tpu.memory_space<vmem>>, vector<8x16xf32>,
    %47 = vector.extract_strided_slice %28 {offsets = [0, 0], sizes = [8, 8], strides = [1, 1]} : vector<16x8xf32> to vector<8x8xf32>
    %48 = vector.extract_strided_slice %32 {offsets = [0, 0], sizes = [16, 8], strides = [1, 1]} : vector<32x8xf32> to vector<16x8xf32>
    %cst_16 = arith.constant dense<0.000000e+00> : vector<8x16xf32>
    %49 = tpu.matmul %47, %48, %cst_16 {dimension_numbers = #tpu.dot_dimension_numbers<[1], [1], [0], [0], [0, 0, 1, 0], [], []>} : vector<8x8xf32>, vector<16x8xf32>, vector<8x16xf32> -> vector<8x16xf32>
    %c16_17 = arith.constant 16 : index
    %c0_18 = arith.constant 0 : index
    %50 = vector.load %arg5[%c16_17, %c0_18] : memref<64x16xf32, #tpu.memory_space<vmem>>, vector<8x16xf32>
    tpu.vector_store %arg5[%c16_17, %c0_18], %49 {strides = array<i32>} : memref<64x16xf32, #tpu.memory_space<vmem>>, vector<8x16xf32>,
    %51 = vector.extract_strided_slice %28 {offsets = [8, 0], sizes = [8, 8], strides = [1, 1]} : vector<16x8xf32> to vector<8x8xf32>
    %52 = vector.extract_strided_slice %32 {offsets = [16, 0], sizes = [16, 8], strides = [1, 1]} : vector<32x8xf32> to vector<16x8xf32>
    %cst_19 = arith.constant dense<0.000000e+00> : vector<8x16xf32>
    %53 = tpu.matmul %51, %52, %cst_19 {dimension_numbers = #tpu.dot_dimension_numbers<[1], [1], [0], [0], [0, 0, 1, 0], [], []>} : vector<8x8xf32>, vector<16x8xf32>, vector<8x16xf32> -> vector<8x16xf32>
    %c24 = arith.constant 24 : index
    %c0_20 = arith.constant 0 : index
    %54 = vector.load %arg5[%c24, %c0_20] : memref<64x16xf32, #tpu.memory_space<vmem>>, vector<8x16xf32>
    tpu.vector_store %arg5[%c24, %c0_20], %53 {strides = array<i32>} : memref<64x16xf32, #tpu.memory_space<vmem>>, vector<8x16xf32>,
    %55 = vector.extract_strided_slice %29 {offsets = [0, 0], sizes = [8, 8], strides = [1, 1]} : vector<16x8xf32> to vector<8x8xf32>
    %56 = vector.extract_strided_slice %33 {offsets = [0, 0], sizes = [16, 8], strides = [1, 1]} : vector<32x8xf32> to vector<16x8xf32>
    %cst_21 = arith.constant dense<0.000000e+00> : vector<8x16xf32>
    %57 = tpu.matmul %55, %56, %cst_21 {dimension_numbers = #tpu.dot_dimension_numbers<[1], [1], [0], [0], [0, 0, 1, 0], [], []>} : vector<8x8xf32>, vector<16x8xf32>, vector<8x16xf32> -> vector<8x16xf32>
    %c32_22 = arith.constant 32 : index
    %c0_23 = arith.constant 0 : index
    %58 = vector.load %arg5[%c32_22, %c0_23] : memref<64x16xf32, #tpu.memory_space<vmem>>, vector<8x16xf32>
    tpu.vector_store %arg5[%c32_22, %c0_23], %57 {strides = array<i32>} : memref<64x16xf32, #tpu.memory_space<vmem>>, vector<8x16xf32>,
    %59 = vector.extract_strided_slice %29 {offsets = [8, 0], sizes = [8, 8], strides = [1, 1]} : vector<16x8xf32> to vector<8x8xf32>
    %60 = vector.extract_strided_slice %33 {offsets = [16, 0], sizes = [16, 8], strides = [1, 1]} : vector<32x8xf32> to vector<16x8xf32>
    %cst_24 = arith.constant dense<0.000000e+00> : vector<8x16xf32>
    %61 = tpu.matmul %59, %60, %cst_24 {dimension_numbers = #tpu.dot_dimension_numbers<[1], [1], [0], [0], [0, 0, 1, 0], [], []>} : vector<8x8xf32>, vector<16x8xf32>, vector<8x16xf32> -> vector<8x16xf32>
    %c40 = arith.constant 40 : index
    %c0_25 = arith.constant 0 : index
    %62 = vector.load %arg5[%c40, %c0_25] : memref<64x16xf32, #tpu.memory_space<vmem>>, vector<8x16xf32>
    tpu.vector_store %arg5[%c40, %c0_25], %61 {strides = array<i32>} : memref<64x16xf32, #tpu.memory_space<vmem>>, vector<8x16xf32>,
    %63 = vector.extract_strided_slice %30 {offsets = [0, 0], sizes = [8, 8], strides = [1, 1]} : vector<16x8xf32> to vector<8x8xf32>
    %64 = vector.extract_strided_slice %34 {offsets = [0, 0], sizes = [16, 8], strides = [1, 1]} : vector<32x8xf32> to vector<16x8xf32>
    %cst_26 = arith.constant dense<0.000000e+00> : vector<8x16xf32>
    %65 = tpu.matmul %63, %64, %cst_26 {dimension_numbers = #tpu.dot_dimension_numbers<[1], [1], [0], [0], [0, 0, 1, 0], [], []>} : vector<8x8xf32>, vector<16x8xf32>, vector<8x16xf32> -> vector<8x16xf32>
    %c48 = arith.constant 48 : index
    %c0_27 = arith.constant 0 : index
    %66 = vector.load %arg5[%c48, %c0_27] : memref<64x16xf32, #tpu.memory_space<vmem>>, vector<8x16xf32>
    tpu.vector_store %arg5[%c48, %c0_27], %65 {strides = array<i32>} : memref<64x16xf32, #tpu.memory_space<vmem>>, vector<8x16xf32>,
    %67 = vector.extract_strided_slice %30 {offsets = [8, 0], sizes = [8, 8], strides = [1, 1]} : vector<16x8xf32> to vector<8x8xf32>
    %68 = vector.extract_strided_slice %34 {offsets = [16, 0], sizes = [16, 8], strides = [1, 1]} : vector<32x8xf32> to vector<16x8xf32>
    %cst_28 = arith.constant dense<0.000000e+00> : vector<8x16xf32>
    %69 = tpu.matmul %67, %68, %cst_28 {dimension_numbers = #tpu.dot_dimension_numbers<[1], [1], [0], [0], [0, 0, 1, 0], [], []>} : vector<8x8xf32>, vector<16x8xf32>, vector<8x16xf32> -> vector<8x16xf32>
    %c56 = arith.constant 56 : index
    %c0_29 = arith.constant 0 : index
    %70 = vector.load %arg5[%c56, %c0_29] : memref<64x16xf32, #tpu.memory_space<vmem>>, vector<8x16xf32>
    tpu.vector_store %arg5[%c56, %c0_29], %69 {strides = array<i32>} : memref<64x16xf32, #tpu.memory_space<vmem>>, vector<8x16xf32>,
    %c0_30 = arith.constant 0 : index
    %c0_31 = arith.constant 0 : index
    %71 = vector.load %arg5[%c0_30, %c0_31] : memref<64x16xf32, #tpu.memory_space<vmem>>, vector<64x16xf32>
    %cst_32 = arith.constant dense<0xFF800000> : vector<64xf32>
    %72 = vector.multi_reduction <maximumf>, %71, %cst_32 [1] : vector<64x16xf32> to vector<64xf32>
    %73 = vector.shape_cast %72 : vector<64xf32> to vector<64x1xf32>
    %74 = vector.broadcast %73 : vector<64x1xf32> to vector<64x16xf32>
    %75 = arith.subf %71, %74 : vector<64x16xf32>
    %76 = math.exp %75 : vector<64x16xf32>
    %cst_33 = arith.constant dense<0.000000e+00> : vector<64xf32>
    %77 = vector.multi_reduction <add>, %76, %cst_33 [1] : vector<64x16xf32> to vector<64xf32>
    %78 = vector.shape_cast %77 : vector<64xf32> to vector<64x1xf32>
    %79 = vector.broadcast %78 : vector<64x1xf32> to vector<64x16xf32>
    %80 = arith.divf %76, %79 : vector<64x16xf32>
    %81 = vector.extract_strided_slice %80 {offsets = [0, 0], sizes = [8, 16], strides = [1, 1]} : vector<64x16xf32> to vector<8x16xf32>
    %82 = vector.extract_strided_slice %35 {offsets = [0, 0], sizes = [16, 8], strides = [1, 1]} : vector<32x8xf32> to vector<16x8xf32>
    %cst_34 = arith.constant dense<0.000000e+00> : vector<8x8xf32>
    %83 = tpu.matmul %81, %82, %cst_34 {dimension_numbers = #tpu.dot_dimension_numbers<[1], [0], [0], [1], [0, 0, 1, 1], [], []>} : vector<8x16xf32>, vector<16x8xf32>, vector<8x8xf32> -> vector<8x8xf32>
    %c0_35 = arith.constant 0 : index
    %c0_36 = arith.constant 0 : index
    %84 = vector.load %arg6[%c0_35, %c0_36] : memref<16x32xf32, #tpu.memory_space<vmem>>, vector<8x8xf32>
    tpu.vector_store %arg6[%c0_35, %c0_36], %83 {strides = array<i32>} : memref<16x32xf32, #tpu.memory_space<vmem>>, vector<8x8xf32>,
    %85 = vector.extract_strided_slice %80 {offsets = [8, 0], sizes = [8, 16], strides = [1, 1]} : vector<64x16xf32> to vector<8x16xf32>
    %86 = vector.extract_strided_slice %35 {offsets = [16, 0], sizes = [16, 8], strides = [1, 1]} : vector<32x8xf32> to vector<16x8xf32>
    %cst_37 = arith.constant dense<0.000000e+00> : vector<8x8xf32>
    %87 = tpu.matmul %85, %86, %cst_37 {dimension_numbers = #tpu.dot_dimension_numbers<[1], [0], [0], [1], [0, 0, 1, 1], [], []>} : vector<8x16xf32>, vector<16x8xf32>, vector<8x8xf32> -> vector<8x8xf32>
    %c8_38 = arith.constant 8 : index
    %c0_39 = arith.constant 0 : index
    %88 = vector.load %arg6[%c8_38, %c0_39] : memref<16x32xf32, #tpu.memory_space<vmem>>, vector<8x8xf32>
    tpu.vector_store %arg6[%c8_38, %c0_39], %87 {strides = array<i32>} : memref<16x32xf32, #tpu.memory_space<vmem>>, vector<8x8xf32>,
    %89 = vector.extract_strided_slice %80 {offsets = [16, 0], sizes = [8, 16], strides = [1, 1]} : vector<64x16xf32> to vector<8x16xf32>
    %90 = vector.extract_strided_slice %36 {offsets = [0, 0], sizes = [16, 8], strides = [1, 1]} : vector<32x8xf32> to vector<16x8xf32>
    %cst_40 = arith.constant dense<0.000000e+00> : vector<8x8xf32>
    %91 = tpu.matmul %89, %90, %cst_40 {dimension_numbers = #tpu.dot_dimension_numbers<[1], [0], [0], [1], [0, 0, 1, 1], [], []>} : vector<8x16xf32>, vector<16x8xf32>, vector<8x8xf32> -> vector<8x8xf32>
    %c0_41 = arith.constant 0 : index
    %c8_42 = arith.constant 8 : index
    %92 = vector.load %arg6[%c0_41, %c8_42] : memref<16x32xf32, #tpu.memory_space<vmem>>, vector<8x8xf32>
    tpu.vector_store %arg6[%c0_41, %c8_42], %91 {strides = array<i32>} : memref<16x32xf32, #tpu.memory_space<vmem>>, vector<8x8xf32>,
    %93 = vector.extract_strided_slice %80 {offsets = [24, 0], sizes = [8, 16], strides = [1, 1]} : vector<64x16xf32> to vector<8x16xf32>
    %94 = vector.extract_strided_slice %36 {offsets = [16, 0], sizes = [16, 8], strides = [1, 1]} : vector<32x8xf32> to vector<16x8xf32>
    %cst_43 = arith.constant dense<0.000000e+00> : vector<8x8xf32>
    %95 = tpu.matmul %93, %94, %cst_43 {dimension_numbers = #tpu.dot_dimension_numbers<[1], [0], [0], [1], [0, 0, 1, 1], [], []>} : vector<8x16xf32>, vector<16x8xf32>, vector<8x8xf32> -> vector<8x8xf32>
    %c8_44 = arith.constant 8 : index
    %c8_45 = arith.constant 8 : index
    %96 = vector.load %arg6[%c8_44, %c8_45] : memref<16x32xf32, #tpu.memory_space<vmem>>, vector<8x8xf32>
    tpu.vector_store %arg6[%c8_44, %c8_45], %95 {strides = array<i32>} : memref<16x32xf32, #tpu.memory_space<vmem>>, vector<8x8xf32>,
    %97 = vector.extract_strided_slice %80 {offsets = [32, 0], sizes = [8, 16], strides = [1, 1]} : vector<64x16xf32> to vector<8x16xf32>
    %98 = vector.extract_strided_slice %37 {offsets = [0, 0], sizes = [16, 8], strides = [1, 1]} : vector<32x8xf32> to vector<16x8xf32>
    %cst_46 = arith.constant dense<0.000000e+00> : vector<8x8xf32>
    %99 = tpu.matmul %97, %98, %cst_46 {dimension_numbers = #tpu.dot_dimension_numbers<[1], [0], [0], [1], [0, 0, 1, 1], [], []>} : vector<8x16xf32>, vector<16x8xf32>, vector<8x8xf32> -> vector<8x8xf32>
    %c0_47 = arith.constant 0 : index
    %c16_48 = arith.constant 16 : index
    %100 = vector.load %arg6[%c0_47, %c16_48] : memref<16x32xf32, #tpu.memory_space<vmem>>, vector<8x8xf32>
    tpu.vector_store %arg6[%c0_47, %c16_48], %99 {strides = array<i32>} : memref<16x32xf32, #tpu.memory_space<vmem>>, vector<8x8xf32>,
    %101 = vector.extract_strided_slice %80 {offsets = [40, 0], sizes = [8, 16], strides = [1, 1]} : vector<64x16xf32> to vector<8x16xf32>
    %102 = vector.extract_strided_slice %37 {offsets = [16, 0], sizes = [16, 8], strides = [1, 1]} : vector<32x8xf32> to vector<16x8xf32>
    %cst_49 = arith.constant dense<0.000000e+00> : vector<8x8xf32>
    %103 = tpu.matmul %101, %102, %cst_49 {dimension_numbers = #tpu.dot_dimension_numbers<[1], [0], [0], [1], [0, 0, 1, 1], [], []>} : vector<8x16xf32>, vector<16x8xf32>, vector<8x8xf32> -> vector<8x8xf32>
    %c8_50 = arith.constant 8 : index
    %c16_51 = arith.constant 16 : index
    %104 = vector.load %arg6[%c8_50, %c16_51] : memref<16x32xf32, #tpu.memory_space<vmem>>, vector<8x8xf32>
    tpu.vector_store %arg6[%c8_50, %c16_51], %103 {strides = array<i32>} : memref<16x32xf32, #tpu.memory_space<vmem>>, vector<8x8xf32>,
    %105 = vector.extract_strided_slice %80 {offsets = [48, 0], sizes = [8, 16], strides = [1, 1]} : vector<64x16xf32> to vector<8x16xf32>
    %106 = vector.extract_strided_slice %38 {offsets = [0, 0], sizes = [16, 8], strides = [1, 1]} : vector<32x8xf32> to vector<16x8xf32>
    %cst_52 = arith.constant dense<0.000000e+00> : vector<8x8xf32>
    %107 = tpu.matmul %105, %106, %cst_52 {dimension_numbers = #tpu.dot_dimension_numbers<[1], [0], [0], [1], [0, 0, 1, 1], [], []>} : vector<8x16xf32>, vector<16x8xf32>, vector<8x8xf32> -> vector<8x8xf32>
    %c0_53 = arith.constant 0 : index
    %c24_54 = arith.constant 24 : index
    %108 = vector.load %arg6[%c0_53, %c24_54] : memref<16x32xf32, #tpu.memory_space<vmem>>, vector<8x8xf32>
    tpu.vector_store %arg6[%c0_53, %c24_54], %107 {strides = array<i32>} : memref<16x32xf32, #tpu.memory_space<vmem>>, vector<8x8xf32>,
    %109 = vector.extract_strided_slice %80 {offsets = [56, 0], sizes = [8, 16], strides = [1, 1]} : vector<64x16xf32> to vector<8x16xf32>
    %110 = vector.extract_strided_slice %38 {offsets = [16, 0], sizes = [16, 8], strides = [1, 1]} : vector<32x8xf32> to vector<16x8xf32>
    %cst_55 = arith.constant dense<0.000000e+00> : vector<8x8xf32>
    %111 = tpu.matmul %109, %110, %cst_55 {dimension_numbers = #tpu.dot_dimension_numbers<[1], [0], [0], [1], [0, 0, 1, 1], [], []>} : vector<8x16xf32>, vector<16x8xf32>, vector<8x8xf32> -> vector<8x8xf32>
    %c8_56 = arith.constant 8 : index
    %c24_57 = arith.constant 24 : index
    %112 = vector.load %arg6[%c8_56, %c24_57] : memref<16x32xf32, #tpu.memory_space<vmem>>, vector<8x8xf32>
    tpu.vector_store %arg6[%c8_56, %c24_57], %111 {strides = array<i32>} : memref<16x32xf32, #tpu.memory_space<vmem>>, vector<8x8xf32>,
    %c0_58 = arith.constant 0 : index
    %c0_59 = arith.constant 0 : index
    %113 = vector.load %arg6[%c0_58, %c0_59] : memref<16x32xf32, #tpu.memory_space<vmem>>, vector<16x32xf32>
    %cst_60 = arith.constant dense<0.000000e+00> : vector<16x32xf32>
    %114 = tpu.matmul %113, %26, %cst_60 {dimension_numbers = #tpu.dot_dimension_numbers<[1], [0], [0], [1], [0, 0, 1, 1], [], []>} : vector<16x32xf32>, vector<32x32xf32>, vector<16x32xf32> -> vector<16x32xf32>
    %115 = arith.addf %0, %114 : vector<16x32xf32>
    %116 = vector.broadcast %11 : vector<1x32xf32> to vector<16x32xf32>
    %117 = arith.addf %115, %116 : vector<16x32xf32>
    %cst_61 = arith.constant dense<0.000000e+00> : vector<16xf32>
    %118 = vector.multi_reduction <add>, %117, %cst_61 [1] : vector<16x32xf32> to vector<16xf32>
    %119 = vector.shape_cast %118 : vector<16xf32> to vector<16x1xf32>
    %cst_62 = arith.constant 3.200000e+01 : f32
    %120 = vector.broadcast %cst_62 : f32 to vector<16x1xf32>
    %121 = arith.divf %119, %120 : vector<16x1xf32>
    %122 = vector.broadcast %121 : vector<16x1xf32> to vector<16x32xf32>
    %123 = arith.subf %117, %122 : vector<16x32xf32>
    %124 = arith.mulf %123, %123 : vector<16x32xf32>
    %cst_63 = arith.constant dense<0.000000e+00> : vector<16xf32>
    %125 = vector.multi_reduction <add>, %124, %cst_63 [1] : vector<16x32xf32> to vector<16xf32>
    %126 = vector.shape_cast %125 : vector<16xf32> to vector<16x1xf32>
    %cst_64 = arith.constant 3.200000e+01 : f32
    %127 = vector.broadcast %cst_64 : f32 to vector<16x1xf32>
    %128 = arith.divf %126, %127 : vector<16x1xf32>
    %129 = vector.broadcast %121 : vector<16x1xf32> to vector<16x32xf32>
    %130 = arith.subf %117, %129 : vector<16x32xf32>
    %cst_65 = arith.constant 9.99999974E-6 : f32
    %131 = vector.broadcast %cst_65 : f32 to vector<16x1xf32>
    %132 = arith.addf %128, %131 : vector<16x1xf32>
    %133 = math.rsqrt %132 : vector<16x1xf32>
    %134 = vector.broadcast %133 : vector<16x1xf32> to vector<16x32xf32>
    %135 = arith.mulf %130, %134 : vector<16x32xf32>
    %136 = vector.broadcast %12 : vector<1x32xf32> to vector<16x32xf32>
    %137 = arith.mulf %135, %136 : vector<16x32xf32>
    %138 = vector.broadcast %13 : vector<1x32xf32> to vector<16x32xf32>
    %139 = arith.addf %137, %138 : vector<16x32xf32>
    %c0_66 = arith.constant 0 : index
    %c0_67 = arith.constant 0 : index
    %140 = vector.load %arg4[%c0_66, %c0_67] : memref<16x32xf32, #tpu.memory_space<vmem>>, vector<16x32xf32>
    tpu.vector_store %arg4[%c0_66, %c0_67], %139 {strides = array<i32>} : memref<16x32xf32, #tpu.memory_space<vmem>>, vector<16x32xf32>,
    return
  }
}

</mosaic_0001>

<bundles_post_ra>
// kernel: cross_attention_layer.1
= control target key start
LH: loop header
LB: loop body
LE: loop exit
PB: predicated region body
PF: predicated region fallthrough
CT: control target
= control target key end

     0   :  { %vm56_vm0 = vcmask 261120   ;;  %v2366_v36 = vmov 0.0|0.0   ;;  %vm2367_vm1 = vmmov 0   ;;  %v2368_v37 = vmov 0.0   ;;  %s2370_s11 = smov 120   ;;  %s2371_s12 = smov 104   ;;  %s2722_s2 = inlined_call_operand.vmem [shape: f32[128,32], index: 2, kind: input, shape index: {}]   ;;  %s2723_s1 = inlined_call_operand.vmem [shape: f32[64,32], index: 1, kind: input, shape index: {}]   ;;  %s2724_s0 = inlined_call_operand.vmem [shape: f32[32,32], index: 0, kind: input, shape index: {}]   ;;  %s2725_s3 = inlined_call_operand.vmem [shape: f32[8,32], index: 3, kind: input, shape index: {}]   ;;  %s2726_s4 = inlined_call_operand.vmem [shape: f32[16,32], index: 4, kind: output, shape index: {}]  }
   0x1   :  { %v39_v0 = vld [vmem:[%s2722_s2 + $0x20] sm:$0xff]  ;;  %v40_v1 = vld [vmem:[%s2722_s2 + $0x28] sm:$0xff]  ;;  %v41_v2 = vld [vmem:[%s2722_s2 + $0x30] sm:$0xff]  ;;  %v52_v38 = vlaneseq  ;;  %vm340_vm2 = vcmask 64512   ;;  %vm420_vm4 = vcmask 130048   ;;  %s2372_s13 = smov 8  }
   0x2   :  { %v2181_v3 = vpack.c.bf16 %v40_v1, %v39_v0  ;;  %v42_v4 = vld [vmem:[%s2722_s2 + $0x38] sm:$0xff]  ;;  %v21_v5 = vld [vmem:[%s2723_s1] sm:$0xff]  ;;  %v22_v10 = vld [vmem:[%s2723_s1 + $0x8] sm:$0xff]  ;;  %s2373_s22 = smov 16   ;;  %s2374_s23 = smov 24   ;;  %vm1329_vm5 = vcmask 130112  }
   0x3   :  { %v25_v6 = vld [vmem:[%s2723_s1 + $0x20] sm:$0xff]  ;;  %v2185_v7 = vpack.c.bf16 %v42_v4, %v41_v2  ;;  %v26_v11 = vld [vmem:[%s2723_s1 + $0x28] sm:$0xff]  ;;  %v23_v14 = vld [vmem:[%s2723_s1 + $0x10] sm:$0xff]  ;;  %v2494_v39 = vshrl.u32 %v52_v38, 7  ;;  %vm1500_vm6 = vcmask 195712   ;;  %vm1669_vm7 = vcmask 261312  }
   0x4   :  { %v31_v8 = vadd.f32 %v25_v6, %v21_v5  ;;  %v35_v9 = vld [vmem:[%s2722_s2] sm:$0xff]  ;;  %2182 = vmatprep.subr.bf16.mxu1 %v2181_v3  ;;  %v36_v12 = vld [vmem:[%s2722_s2 + $0x8] sm:$0xff]  ;;  %v27_v15 = vld [vmem:[%s2723_s1 + $0x30] sm:$0xff]  ;;  %v32_v23 = vadd.f32 %v26_v11, %v22_v10 }
   0x5   :  { %2184 = vmatpush3.bf16.msra.mxu1 %v2181_v3  ;;  %v2173_v13 = vpack.c.bf16 %v36_v12, %v35_v9  ;;  %v37_v16 = vld [vmem:[%s2722_s2 + $0x10] sm:$0xff]  ;;  %v38_v17 = vld [vmem:[%s2722_s2 + $0x18] sm:$0xff]  ;;  %v2446_v18 = vld [vmem:[%s2724_s0] sm:$0xff]  ;;  %v33_v27 = vadd.f32 %v27_v15, %v23_v14  ;;  %v140_v40 = vsub.s32 1, %v2494_v39  ;;  %v54_v47 = vsub.s32 0, %v2494_v39 }
   0x6   :  { %2030 = vmatprep.mubr.msk.f32.mxu1 %vm56_vm0, %v31_v8  ;;  %2186 = vmatprep.subr.bf16.mxu1 %v2185_v7  ;;  %v19_v19 = vld [vmem:[%s2724_s0 + $0x10] sm:$0xff]  ;;  %v2177_v20 = vpack.c.bf16 %v38_v17, %v37_v16  ;;  %v43_v22 = vld [vmem:[%s2722_s2 + $0x40] sm:$0xff]  ;;  %v2458_v24 = vld [vmem:[%s2724_s0 + $0x8] sm:$0xff]  ;;  %v241_v63 = vsub.s32 2, %v2494_v39 }
   0x7   :  { %2174 = vmatprep.subr.bf16.mxu0 %v2173_v13  ;;  %v29_v21 = vadd.f32 %v19_v19, %v2446_v18  ;;  %v20_v25 = vld [vmem:[%s2724_s0 + $0x18] sm:$0xff]  ;;  %v44_v26 = vld [vmem:[%s2722_s2 + $0x48] sm:$0xff]  ;;  %v45_v33 = vld [vmem:[%s2722_s2 + $0x50] sm:$0xff] }
   0x8   :  { %2176 = vmatpush3.bf16.msra.mxu0 %v2173_v13  ;;  %v24_v28 = vld [vmem:[%s2723_s1 + $0x18] sm:$0xff]  ;;  %v2189_v30 = vpack.c.bf16 %v44_v26, %v43_v22  ;;  %v30_v31 = vadd.f32 %v20_v25, %v2458_v24  ;;  %v2500_v41 = vld [vmem:[%s2725_s3] sm:$0xff]  ;;  %vm2506_vm3 = vmpackc.low %vm340_vm2, %vm340_vm2  ;;  %s2369_s3 = smov 112  }
   0x9   :  { %2188 = vmatpush3.bf16.msra.mxu1 %v2185_v7  ;;  %v28_v29 = vld [vmem:[%s2723_s1 + $0x38] sm:$0xff]  ;;  %2178 = vmatprep.subr.bf16.mxu0 %v2177_v20  ;;  %v141_v42 = vrot.slane %v2500_v41, %v140_v40  ;;  %v55_v57 = vrot.slane %v2500_v41, %v54_v47  ;;  %v242_v0 = vrot.slane %v2500_v41, %v241_v63 }
   0xa   :  { %2019 = vmatprep.mubr.msk.f32.mxu0 %vm56_vm0, %v29_v21  ;;  %v34_v32 = vadd.f32 %v28_v29, %v24_v28  ;;  %v46_v34 = vld [vmem:[%s2722_s2 + $0x58] sm:$0xff]  ;;  %2197 = vmatprep.subr.bf16.mxu1 %v2366_v36 }
   0xb   :  { %v2193_v35 = vpack.c.bf16 %v46_v34, %v45_v33 }
   0xc   :  { %2031 = vmatmul.mubr.msk.f32.vlgmr.msra.gmra.mrb[0].mxu1 %vm56_vm0, %v32_v23  ;;  %2180 = vmatpush3.bf16.msra.mxu0 %v2177_v20 }
   0xd   :  { %2033 = vmatprep.mubr.msk.f32.mxu1 %vm56_vm0, %v33_v27  ;;  %2190 = vmatprep.subr.bf16.mxu0 %v2189_v30 }
   0xf   :  { %2020 = vmatmul.mubr.msk.f32.vlgmr.msra.gmra.mrb[0].mxu0 %vm56_vm0, %v30_v31 }
  0x10   :  { %2034 = vmatmul.mubr.msk.f32.gmra.mrb[2].mxu1 %vm56_vm0, %v34_v32  ;;  %2192 = vmatpush3.bf16.msra.mxu0 %v2189_v30 }
  0x11   :  { %2044 = vmatprep.mubr.msk.f32.mxu0 %vm56_vm0, %v21_v5  ;;  %2194 = vmatprep.subr.bf16.mxu0 %v2193_v35 }
  0x12   :  { %2054 = vmatprep.mubr.msk.f32.mxu1 %vm2367_vm1, %v2368_v37 }
  0x14   :  { %2196 = vmatpush3.bf16.msra.mxu0 %v2193_v35 }
  0x15   :  { %2201 = vmatprep.subr.bf16.mxu0 %v2366_v36 }
  0x17   :  { %2045 = vmatmul.mubr.msk.f32.vlgmr.msra.gmra.mrb[2].mxu0 %vm56_vm0, %v22_v10 }
  0x18   :  { %2047 = vmatprep.mubr.msk.f32.mxu0 %vm56_vm0, %v23_v14 }
  0x1b   :  { %2048 = vmatmul.mubr.msk.f32.gmra.mrb[4].mxu0 %vm56_vm0, %v24_v28 }
  0x1c   :  { %2061 = vmatprep.mubr.msk.f32.mxu0 %vm2367_vm1, %v2368_v37 }
  0xdf   :  { %v2032_v43 = vpop.f32.mrb[0].mxu1 }
  0xe0   :  { %v226_v44 = vadd.f32 %v2032_v43, %v141_v42  ;;  %v220_v45 = vpop.f32.mrb[1].mxu1 }
  0xe1   :  { %v221_v46 = vadd.f32 %v220_v45, %v141_v42 }
  0xe2   :  { %v2021_v48 = vpop.f32.mrb[0].mxu0 }
  0xe3   :  { %v2198_v49 = vpack.c.bf16 %v226_v44, %v221_v46  ;;  %v2035_v50 = vpop.f32.mrb[2].mxu1  ;;  %v2280_v51 = vpack.i.bf16 %v226_v44, %v221_v46  ;;  %v129_v53 = vpop.f32.mrb[1].mxu0  ;;  %v135_v60 = vadd.f32 %v2021_v48, %v55_v57 }
  0xe4   :  { %v236_v54 = vadd.f32 %v2035_v50, %v141_v42  ;;  %v230_v55 = vpop.f32.mrb[3].mxu1  ;;  %v130_v61 = vadd.f32 %v129_v53, %v55_v57 }
  0xe5   :  { %v231_v56 = vadd.f32 %v230_v55, %v141_v42  ;;  %2281 = vrot.lane.b32.xlu1 %v2280_v51, %s2369_s3  ;;  %2271 = vrot.lane.b32.xlu0 %v2280_v51, %s2370_s11 }
  0xe6   :  { %2200 = vmatpush3.bf16.xpose.msk.msra.mxu1 %vm2506_vm3, %v2198_v49 }
  0xe7   :  { %v2202_v58 = vpack.c.bf16 %v236_v54, %v231_v56  ;;  %v2285_v59 = vpack.i.bf16 %v236_v54, %v231_v56  ;;  %2205 = vmatprep.subr.bf16.mxu1 %v2366_v36 }
  0xe9   :  { %2286 = vrot.lane.b32.xlu1 %v2285_v59, %s2369_s3  ;;  %2276 = vrot.lane.b32.xlu0 %v2285_v59, %s2370_s11 }
  0xea   :  { %2204 = vmatpush3.bf16.xpose.msk.msra.mxu0 %vm2506_vm3, %v2202_v58  ;;  %v2046_v62 = vpop.f32.mrb[2].mxu0 }
  0xeb   :  { %2209 = vmatprep.subr.bf16.mxu0 %v2366_v36  ;;  %v321_v1 = vpop.f32.mrb[3].mxu0  ;;  %v2564_v34 = vadd.f32 %v2046_v62, %v242_v0 }
  0xec   :  { %v2566_v35 = vadd.f32 %v321_v1, %v242_v0 }
  0xed   :  { %2055 = vmatmul.mubr.msk.f32.vlgmr.msra.gmra.mrb[4].mxu1 %vm340_vm2, %v130_v61  ;;  %585 = vrot.lane.b32.xlu1 %v135_v60, %s2370_s11 }
  0xee   :  { %502 = vrot.lane.b32.xlu0 %v130_v61, %s2370_s11  ;;  %2068 = vmatprep.mubr.msk.f32.mxu1 %vm2367_vm1, %v2368_v37  ;;  %v2049_v2 = vpop.f32.mrb[4].mxu0  ;;  %v2230_v42 = vpack.c.bf16 %v2564_v34, %v2566_v35 }
  0xef   :  { %v2537_v3 = vadd.f32 %v2049_v2, %v242_v0  ;;  %v331_v4 = vpop.f32.mrb[5].mxu0 }
  0xf0   :  { %v2539_v5 = vadd.f32 %v331_v4, %v242_v0 }
  0xf1   :  { %2062 = vmatmul.mubr.msk.f32.vlgmr.msra.gmra.mrb[6].mxu0 %vm340_vm2, %v135_v60  ;;  %2296 = vrot.lane.b32.xlu1 %v2285_v59, %s2371_s12 }
  0xf2   :  { %2291 = vrot.lane.b32.xlu0 %v2280_v51, %s2371_s12  ;;  %2075 = vmatprep.mubr.msk.f32.mxu0 %vm2367_vm1, %v2368_v37  ;;  %v2586_v45 = vpack.i.bf16 %v2537_v3, %v2539_v5  ;;  %v2233_v46 = vpack.c.bf16 %v2537_v3, %v2539_v5 }
  0xf5   :  { %751 = vrot.lane.b32.xlu1 %v135_v60, %s2369_s3 }
  0xf6   :  { %668 = vrot.lane.b32.xlu0 %v130_v61, %s2369_s3 }
  0xf9   :  { %917 = vrot.lane.b32.xlu1 %v135_v60, %s2371_s12 }
  0xfa   :  { %834 = vrot.lane.b32.xlu0 %v130_v61, %s2371_s12 }
 0x157   :  { %v2282_v6 = vpop.permute.xlu1 %2281  ;;  %v2272_v7 = vpop.permute.xlu0 %2271 }
 0x158   :  { %v2274_v8 = vunpack.i.h.bf16 %v2272_v7  ;;  %v2273_v9 = vunpack.i.l.bf16 %v2272_v7  ;;  %v2284_v15 = vunpack.i.h.bf16 %v2282_v6  ;;  %v2283_v16 = vunpack.i.l.bf16 %v2282_v6 }
 0x15a   :  { %v2206_v10 = vpack.c.bf16 %v2274_v8, %v2273_v9  ;;  %v2214_v21 = vpack.c.bf16 %v2284_v15, %v2283_v16 }
 0x15b   :  { %v2287_v11 = vpop.permute.xlu1 %2286  ;;  %v2277_v12 = vpop.permute.xlu0 %2276 }
 0x15c   :  { %v2279_v13 = vunpack.i.h.bf16 %v2277_v12  ;;  %v2278_v14 = vunpack.i.l.bf16 %v2277_v12  ;;  %2208 = vmatpush3.bf16.xpose.msk.msra.mxu1 %vm2506_vm3, %v2206_v10  ;;  %v2289_v22 = vunpack.i.h.bf16 %v2287_v11  ;;  %v2288_v23 = vunpack.i.l.bf16 %v2287_v11 }
 0x15d   :  { %2213 = vmatprep.subr.bf16.mxu1 %v2366_v36 }
 0x15e   :  { %v2210_v17 = vpack.c.bf16 %v2279_v13, %v2278_v14  ;;  %v2218_v26 = vpack.c.bf16 %v2289_v22, %v2288_v23 }
 0x15f   :  { %v586_v20 = vpop.permute.xlu1 %585 }
 0x160   :  { %v503_v19 = vpop.permute.xlu0 %502  ;;  %2212 = vmatpush3.bf16.xpose.msk.msra.mxu0 %vm2506_vm3, %v2210_v17  ;;  %v2608_v17 = vpack.i.bf16 %v2564_v34, %v2566_v35 }
 0x161   :  { %2217 = vmatprep.subr.bf16.mxu0 %v2366_v36 }
 0x163   :  { %2069 = vmatmul.mubr.msk.f32.vlgmr.msra.gmra.mrb[6].mxu1 %vm340_vm2, %v503_v19  ;;  %v2297_v29 = vpop.permute.xlu1 %2296 }
 0x164   :  { %v2292_v25 = vpop.permute.xlu0 %2291  ;;  %2216 = vmatpush3.bf16.xpose.msk.msra.mxu1 %vm2506_vm3, %v2214_v21  ;;  %2082 = vmatprep.mubr.msk.f32.mxu1 %vm2367_vm1, %v2368_v37  ;;  %v2299_v30 = vunpack.i.h.bf16 %v2297_v29  ;;  %v2298_v31 = vunpack.i.l.bf16 %v2297_v29 }
 0x165   :  { %2221 = vmatprep.subr.bf16.mxu1 %v2366_v36  ;;  %v2294_v27 = vunpack.i.h.bf16 %v2292_v25  ;;  %v2293_v28 = vunpack.i.l.bf16 %v2292_v25 }
 0x166   :  { %v2226_v38 = vpack.c.bf16 %v2299_v30, %v2298_v31 }
 0x167   :  { %2076 = vmatmul.mubr.msk.f32.vlgmr.msra.gmra.mrb[8].mxu0 %vm340_vm2, %v586_v20  ;;  %v2222_v32 = vpack.c.bf16 %v2294_v27, %v2293_v28  ;;  %v752_v40 = vpop.permute.xlu1 %751 }
 0x168   :  { %2220 = vmatpush3.bf16.xpose.msk.msra.mxu0 %vm2506_vm3, %v2218_v26  ;;  %2089 = vmatprep.mubr.msk.f32.mxu0 %vm2367_vm1, %v2368_v37  ;;  %v669_v33 = vpop.permute.xlu0 %668 }
 0x169   :  { %2225 = vmatprep.subr.bf16.mxu0 %v2366_v36 }
 0x16b   :  { %2083 = vmatmul.mubr.msk.f32.vlgmr.msra.gmra.mrb[8].mxu1 %vm340_vm2, %v669_v33  ;;  %v918_v44 = vpop.permute.xlu1 %917 }
 0x16c   :  { %2224 = vmatpush3.bf16.xpose.msk.msra.mxu1 %vm2506_vm3, %v2222_v32  ;;  %2096 = vmatprep.mubr.msk.f32.mxu1 %vm2367_vm1, %v2368_v37  ;;  %v835_v43 = vpop.permute.xlu0 %834 }
 0x16d   :  { %2229 = vmatprep.subr.bf16.mxu1 %v2366_v36 }
 0x16f   :  { %2090 = vmatmul.mubr.msk.f32.vlgmr.msra.gmra.mrb[10].mxu0 %vm340_vm2, %v752_v40 }
 0x170   :  { %2228 = vmatpush3.bf16.xpose.msk.msra.mxu0 %vm2506_vm3, %v2226_v38  ;;  %2103 = vmatprep.mubr.msk.f32.mxu0 %vm2367_vm1, %v2368_v37 }
 0x171   :  { %2241 = vmatprep.subr.bf16.mxu0 %v2366_v36 }
 0x173   :  { %2097 = vmatmul.mubr.msk.f32.vlgmr.msra.gmra.mrb[10].mxu1 %vm340_vm2, %v835_v43 }
 0x174   :  { %2231 = vmatpush3.bf16.msra.mxu1 %v2230_v42  ;;  %2110 = vmatprep.mubr.msk.f32.mxu1 %vm2367_vm1, %v2368_v37 }
 0x175   :  { %2232 = vmatprep.subr.bf16.mxu1 %v2366_v36 }
 0x177   :  { %2104 = vmatmul.mubr.msk.f32.vlgmr.msra.gmra.mrb[12].mxu0 %vm340_vm2, %v918_v44 }
 0x178   :  { %2138 = vmatprep.mubr.msk.f32.mxu0 %vm2367_vm1, %v2368_v37 }
 0x1c0   :  { %v416_v47 = vpop.f32.mrb[4].mxu1 }
 0x1c1   :  { %421 = vst.msk [vmem:[#allocation2] sm:$0xff] %vm420_vm4, %v416_v47  ;;  %v2056_v48 = vpop.f32.mrb[5].mxu1 }
 0x1c4   :  { %v497_v49 = vpop.f32.mrb[6].mxu0 }
 0x1c5   :  { %501 = vst.msk [vmem:[#allocation2 + $0x8] sm:$0xff] %vm420_vm4, %v497_v49  ;;  %v2063_v50 = vpop.f32.mrb[7].mxu0 }
 0x1c8   :  { %v1000_v51 = vld [vmem:[#allocation2] sm:$0xff] }
 0x1c9   :  { %v1008_v52 = vsel %vm420_vm4, %v1000_v51, -inf }
 0x1ca   :  { %1009 = vmax.xlane.f32.xlu0 %v1008_v52 }
 0x1cc   :  { %v1001_v53 = vld [vmem:[#allocation2 + $0x8] sm:$0xff] }
 0x1cd   :  { %v1011_v54 = vsel %vm420_vm4, %v1001_v53, -inf }
 0x1ce   :  { %1012 = vmax.xlane.f32.xlu1 %v1011_v54 }
 0x236   :  { %v580_v55 = vpop.f32.mrb[6].mxu1 }
 0x237   :  { %584 = vst.msk [vmem:[#allocation2 + $0x10] sm:$0xff] %vm420_vm4, %v580_v55  ;;  %v2070_v56 = vpop.f32.mrb[7].mxu1 }
 0x23a   :  { %v663_v57 = vpop.f32.mrb[8].mxu0 }
 0x23b   :  { %667 = vst.msk [vmem:[#allocation2 + $0x18] sm:$0xff] %vm420_vm4, %v663_v57  ;;  %v2077_v58 = vpop.f32.mrb[9].mxu0 }
 0x23e   :  { %v746_v59 = vpop.f32.mrb[8].mxu1  ;;  %v1002_v60 = vld [vmem:[#allocation2 + $0x10] sm:$0xff] }
 0x23f   :  { %750 = vst.msk [vmem:[#allocation2 + $0x20] sm:$0xff] %vm420_vm4, %v746_v59  ;;  %v2084_v61 = vpop.f32.mrb[9].mxu1  ;;  %v1014_v62 = vsel %vm420_vm4, %v1002_v60, -inf }
 0x240   :  { %1015 = vmax.xlane.f32.xlu0 %v1014_v62 }
 0x242   :  { %v829_v63 = vpop.f32.mrb[10].mxu0  ;;  %v1003_v0 = vld [vmem:[#allocation2 + $0x18] sm:$0xff] }
 0x243   :  { %833 = vst.msk [vmem:[#allocation2 + $0x28] sm:$0xff] %vm420_vm4, %v829_v63  ;;  %v2091_v1 = vpop.f32.mrb[11].mxu0  ;;  %v1017_v2 = vsel %vm420_vm4, %v1003_v0, -inf }
 0x244   :  { %1018 = vmax.xlane.f32.xlu0 %v1017_v2 }
 0x246   :  { %v912_v4 = vpop.f32.mrb[10].mxu1  ;;  %v1004_v6 = vld [vmem:[#allocation2 + $0x20] sm:$0xff] }
 0x247   :  { %916 = vst.msk [vmem:[#allocation2 + $0x30] sm:$0xff] %vm420_vm4, %v912_v4  ;;  %v2098_v7 = vpop.f32.mrb[11].mxu1  ;;  %v1020_v8 = vsel %vm420_vm4, %v1004_v6, -inf }
 0x248   :  { %1021 = vmax.xlane.f32.xlu1 %v1020_v8 }
 0x24a   :  { %v995_v9 = vpop.f32.mrb[12].mxu0  ;;  %v1005_v10 = vld [vmem:[#allocation2 + $0x28] sm:$0xff] }
 0x24b   :  { %999 = vst.msk [vmem:[#allocation2 + $0x38] sm:$0xff] %vm420_vm4, %v995_v9  ;;  %v2105_v11 = vpop.f32.mrb[13].mxu0  ;;  %v1023_v12 = vsel %vm420_vm4, %v1005_v10, -inf }
 0x24c   :  { %1024 = vmax.xlane.f32.xlu0 %v1023_v12 }
 0x24e   :  { %v1006_v13 = vld [vmem:[#allocation2 + $0x30] sm:$0xff] }
 0x24f   :  { %v1026_v14 = vsel %vm420_vm4, %v1006_v13, -inf }
 0x250   :  { %1027 = vmax.xlane.f32.xlu1 %v1026_v14 }
 0x252   :  { %v1007_v15 = vld [vmem:[#allocation2 + $0x38] sm:$0xff] }
 0x253   :  { %v1029_v16 = vsel %vm420_vm4, %v1007_v15, -inf }
 0x254   :  { %1030 = vmax.xlane.f32.xlu0 %v1029_v16 }
 0x257   :  { %v1010_v21 = vpop.xlane.xlu0 %1009 }
 0x258   :  { %v1032_v22 = vsub.f32 %v1000_v51, %v1010_v21 }
 0x25a   :  { %v1040_v25 = vmul.f32 1.442695, %v1032_v22 }
 0x25b   :  { %v1013_v19 = vpop.xlane.xlu1 %1012 }
 0x25c   :  { %v1033_v20 = vsub.f32 %v1001_v53, %v1013_v19 }
 0x25e   :  { %v1042_v23 = vmul.f32 1.442695, %v1033_v20 }
 0x260   :  { %2330 = vpow2.f32 %v1042_v23 }
 0x261   :  { %2301 = vrot.lane.b32.xlu1 %v2608_v17, %s2370_s11  ;;  %2332 = vpow2.f32 %v1040_v25 }
 0x265   :  { %2311 = vrot.lane.b32.xlu1 %v2608_v17, %s2369_s3 }
 0x269   :  { %2316 = vrot.lane.b32.xlu1 %v2586_v45, %s2369_s3 }
 0x26a   :  { %2306 = vrot.lane.b32.xlu0 %v2586_v45, %s2370_s11  ;;  %v2618_v26 = vpop.eup %2330 }
 0x26b   :  { %v1059_v27 = vsel %vm420_vm4, %v2618_v26, 0.0  ;;  %v2333_v28 = vpop.eup %2332 }
 0x26c   :  { %v1056_v29 = vsel %vm420_vm4, %v2333_v28, 0.0 }
 0x289   :  { %1060 = vadd.xlane.f32.xlu0 %v1059_v27 }
 0x28d   :  { %1057 = vadd.xlane.f32.xlu1 %v1056_v29 }
 0x2cd   :  { %v1016_v30 = vpop.xlane.xlu0 %1015 }
 0x2ce   :  { %v1034_v31 = vsub.f32 %v1002_v60, %v1016_v30 }
 0x2d0   :  { %v1044_v32 = vmul.f32 1.442695, %v1034_v31 }
 0x2d1   :  { %v1019_v33 = vpop.xlane.xlu0 %1018 }
 0x2d2   :  { %2334 = vpow2.f32 %v1044_v32  ;;  %v1035_v34 = vsub.f32 %v1003_v0, %v1019_v33 }
 0x2d4   :  { %v1046_v35 = vmul.f32 1.442695, %v1035_v34 }
 0x2d5   :  { %v1022_v38 = vpop.xlane.xlu1 %1021 }
 0x2d6   :  { %2336 = vpow2.f32 %v1046_v35  ;;  %v1036_v40 = vsub.f32 %v1004_v6, %v1022_v38 }
 0x2d8   :  { %v1048_v42 = vmul.f32 1.442695, %v1036_v40 }
 0x2d9   :  { %v1025_v43 = vpop.xlane.xlu0 %1024 }
 0x2da   :  { %2338 = vpow2.f32 %v1048_v42  ;;  %v1037_v44 = vsub.f32 %v1005_v10, %v1025_v43 }
 0x2dc   :  { %v2623_v47 = vpop.eup %2334  ;;  %v1050_v48 = vmul.f32 1.442695, %v1037_v44 }
 0x2dd   :  { %v1028_v49 = vpop.xlane.xlu1 %1027  ;;  %v1062_v50 = vsel %vm420_vm4, %v2623_v47, 0.0 }
 0x2de   :  { %2340 = vpow2.f32 %v1050_v48  ;;  %v1038_v51 = vsub.f32 %v1006_v13, %v1028_v49  ;;  %1063 = vadd.xlane.f32.xlu1 %v1062_v50 }
 0x2e0   :  { %v2627_v52 = vpop.eup %2336  ;;  %v1052_v53 = vmul.f32 1.442695, %v1038_v51 }
 0x2e1   :  { %v1031_v54 = vpop.xlane.xlu0 %1030  ;;  %v2302_v55 = vpop.permute.xlu1 %2301  ;;  %v1065_v56 = vsel %vm420_vm4, %v2627_v52, 0.0 }
 0x2e2   :  { %2342 = vpow2.f32 %v1052_v53  ;;  %v1039_v57 = vsub.f32 %v1007_v15, %v1031_v54  ;;  %1066 = vadd.xlane.f32.xlu0 %v1065_v56  ;;  %v2304_v16 = vunpack.i.h.bf16 %v2302_v55  ;;  %v2303_v19 = vunpack.i.l.bf16 %v2302_v55 }
 0x2e4   :  { %v2631_v58 = vpop.eup %2338  ;;  %v1054_v59 = vmul.f32 1.442695, %v1039_v57 }
 0x2e5   :  { %v2312_v60 = vpop.permute.xlu1 %2311  ;;  %v1068_v61 = vsel %vm420_vm4, %v2631_v58, 0.0  ;;  %v2307_v9 = vpop.permute.xlu0 %2306 }
 0x2e6   :  { %2344 = vpow2.f32 %v1054_v59  ;;  %v2314_v62 = vunpack.i.h.bf16 %v2312_v60  ;;  %1069 = vadd.xlane.f32.xlu1 %v1068_v61  ;;  %v2313_v63 = vunpack.i.l.bf16 %v2312_v60  ;;  %v2308_v21 = vunpack.i.l.bf16 %v2307_v9 }
 0x2e8   :  { %v2635_v0 = vpop.eup %2340  ;;  %v2242_v1 = vpack.c.bf16 %v2314_v62, %v2313_v63  ;;  %v47_v62 = vld [vmem:[%s2722_s2 + $0x60] sm:$0xff]  ;;  %v48_v63 = vld [vmem:[%s2722_s2 + $0x68] sm:$0xff] }
 0x2e9   :  { %v1071_v2 = vsel %vm420_vm4, %v2635_v0, 0.0  ;;  %v2317_v10 = vpop.permute.xlu1 %2316 }
 0x2ea   :  { %1072 = vadd.xlane.f32.xlu0 %v1071_v2  ;;  %2243 = vmatpush3.bf16.msra.mxu0 %v2242_v1  ;;  %v2319_v27 = vunpack.i.h.bf16 %v2317_v10  ;;  %v49_v2 = vld [vmem:[%s2722_s2 + $0x70] sm:$0xff] }
 0x2eb   :  { %2247 = vmatprep.subr.bf16.mxu0 %v2366_v36 }
 0x2ec   :  { %v2639_v4 = vpop.eup %2342 }
 0x2ed   :  { %v1074_v6 = vsel %vm420_vm4, %v2639_v4, 0.0 }
 0x2ee   :  { %1075 = vadd.xlane.f32.xlu1 %v1074_v6 }
 0x2f0   :  { %v2644_v7 = vpop.eup %2344 }
 0x2f1   :  { %v1077_v8 = vsel %vm420_vm4, %v2644_v7, 0.0 }
 0x2f2   :  { %1078 = vadd.xlane.f32.xlu0 %v1077_v8 }
 0x2ff   :  { %2326 = vrot.lane.b32.xlu1 %v2586_v45, %s2371_s12 }
 0x308   :  { %2321 = vrot.lane.b32.xlu0 %v2608_v17, %s2371_s12  ;;  %v2236_v17 = vpack.c.bf16 %v2304_v16, %v2303_v19 }
 0x316   :  { %v1061_v11 = vpop.xlane.xlu0 %1060 }
 0x31a   :  { %v1058_v12 = vpop.xlane.xlu1 %1057 }
 0x31b   :  { %2346 = vrcp.f32 %v1058_v12 }
 0x31c   :  { %2348 = vrcp.f32 %v1061_v11 }
 0x325   :  { %v2347_v13 = vpop.eup %2346 }
 0x326   :  { %v1081_v14 = vmul.f32 %v2347_v13, %v2333_v28  ;;  %v2349_v15 = vpop.eup %2348  ;;  %v2318_v28 = vunpack.i.l.bf16 %v2317_v10 }
 0x327   :  { %v1083_v45 = vmul.f32 %v2349_v15, %v2618_v26 }
 0x328   :  { %2111 = vmatmul.mubr.msk.f32.vlgmr.msra.gmra.mrb[12].mxu1 %vm420_vm4, %v1081_v14  ;;  %v2245_v32 = vpack.c.bf16 %v2319_v27, %v2318_v28 }
 0x329   :  { %2234 = vmatpush3.bf16.msra.mxu1 %v2233_v46  ;;  %2117 = vmatprep.mubr.msk.f32.mxu1 %vm2367_vm1, %v2368_v37  ;;  %v2309_v46 = vunpack.i.h.bf16 %v2307_v9 }
 0x32a   :  { %2235 = vmatprep.subr.bf16.mxu1 %v2366_v36 }
 0x32b   :  { %v2239_v26 = vpack.c.bf16 %v2309_v46, %v2308_v21 }
 0x32c   :  { %2118 = vmatmul.mubr.msk.f32.vlgmr.msra.gmra.mrb[14].mxu1 %vm420_vm4, %v1083_v45 }
 0x32d   :  { %2237 = vmatpush3.bf16.msra.mxu1 %v2236_v17  ;;  %2124 = vmatprep.mubr.msk.f32.mxu1 %vm2367_vm1, %v2368_v37 }
 0x32e   :  { %2238 = vmatprep.subr.bf16.mxu1 %v2366_v36 }
 0x36b   :  { %v1064_v20 = vpop.xlane.xlu1 %1063 }
 0x36c   :  { %2350 = vrcp.f32 %v1064_v20 }
 0x36f   :  { %v1067_v3 = vpop.xlane.xlu0 %1066 }
 0x370   :  { %2352 = vrcp.f32 %v1067_v3 }
 0x373   :  { %v1070_v5 = vpop.xlane.xlu1 %1069 }
 0x374   :  { %2354 = vrcp.f32 %v1070_v5  ;;  %v1842_v5 = vsub.s32 3, %v2494_v39 }
 0x376   :  { %v2351_v22 = vpop.eup %2350  ;;  %v1843_v46 = vrot.slane %v2500_v41, %v1842_v5 }
 0x377   :  { %v1085_v23 = vmul.f32 %v2351_v22, %v2623_v47  ;;  %v1073_v25 = vpop.xlane.xlu0 %1072 }
 0x378   :  { %2356 = vrcp.f32 %v1073_v25 }
 0x379   :  { %2125 = vmatmul.mubr.msk.f32.vlgmr.msra.gmra.mrb[16].mxu1 %vm420_vm4, %v1085_v23 }
 0x37a   :  { %v2353_v29 = vpop.eup %2352  ;;  %2240 = vmatpush3.bf16.msra.mxu1 %v2239_v26  ;;  %2131 = vmatprep.mubr.msk.f32.mxu1 %vm2367_vm1, %v2368_v37 }
 0x37b   :  { %v1087_v30 = vmul.f32 %v2353_v29, %v2627_v52  ;;  %v1076_v31 = vpop.xlane.xlu1 %1075  ;;  %2244 = vmatprep.subr.bf16.mxu1 %v2366_v36 }
 0x37c   :  { %2358 = vrcp.f32 %v1076_v31 }
 0x37d   :  { %2132 = vmatmul.mubr.msk.f32.vlgmr.msra.gmra.mrb[18].mxu1 %vm420_vm4, %v1087_v30 }
 0x37e   :  { %v2355_v33 = vpop.eup %2354  ;;  %2246 = vmatpush3.bf16.msra.mxu1 %v2245_v32  ;;  %2145 = vmatprep.mubr.msk.f32.mxu1 %vm2367_vm1, %v2368_v37 }
 0x37f   :  { %v1089_v34 = vmul.f32 %v2355_v33, %v2631_v58  ;;  %v1079_v35 = vpop.xlane.xlu0 %1078  ;;  %v2327_v38 = vpop.permute.xlu1 %2326  ;;  %2250 = vmatprep.subr.bf16.mxu1 %v2366_v36 }
 0x380   :  { %2360 = vrcp.f32 %v1079_v35  ;;  %v2329_v40 = vunpack.i.h.bf16 %v2327_v38  ;;  %v2328_v42 = vunpack.i.l.bf16 %v2327_v38 }
 0x381   :  { %2139 = vmatmul.mubr.msk.f32.vlgmr.msra.gmra.mrb[14].mxu0 %vm420_vm4, %v1089_v34 }
 0x382   :  { %v2357_v43 = vpop.eup %2356  ;;  %v2251_v44 = vpack.c.bf16 %v2329_v40, %v2328_v42  ;;  %2152 = vmatprep.mubr.msk.f32.mxu0 %vm2367_vm1, %v2368_v37 }
 0x383   :  { %v1091_v47 = vmul.f32 %v2357_v43, %v2635_v0  ;;  %v2322_v48 = vpop.permute.xlu0 %2321  ;;  %v2253_v0 = vpack.c.bf16 %v48_v63, %v47_v62 }
 0x384   :  { %v2324_v49 = vunpack.i.h.bf16 %v2322_v48  ;;  %v2323_v50 = vunpack.i.l.bf16 %v2322_v48 }
 0x385   :  { %2146 = vmatmul.mubr.msk.f32.vlgmr.msra.gmra.mrb[20].mxu1 %vm420_vm4, %v1091_v47 }
 0x386   :  { %v2359_v51 = vpop.eup %2358  ;;  %v2248_v52 = vpack.c.bf16 %v2324_v49, %v2323_v50  ;;  %2252 = vmatpush3.bf16.msra.mxu1 %v2251_v44  ;;  %2159 = vmatprep.mubr.msk.f32.mxu1 %vm2367_vm1, %v2368_v37  ;;  %v1875_v50 = vsub.s32 4, %v2494_v39 }
 0x387   :  { %v1093_v36 = vmul.f32 %v2359_v51, %v2639_v4  ;;  %v50_v4 = vld [vmem:[%s2722_s2 + $0x78] sm:$0xff]  ;;  %v1881_v51 = vsub.s32 5, %v2494_v39 }
 0x388   :  { %2249 = vmatpush3.bf16.msra.mxu0 %v2248_v52  ;;  %v1876_v52 = vrot.slane %v2500_v41, %v1875_v50 }
 0x389   :  { %2254 = vmatprep.subr.bf16.mxu0 %v2253_v0 }
 0x38a   :  { %v2361_v53 = vpop.eup %2360 }
 0x38b   :  { %v1095_v54 = vmul.f32 %v2361_v53, %v2644_v7  ;;  %2153 = vmatmul.mubr.msk.f32.vlgmr.msra.gmra.mrb[16].mxu0 %vm420_vm4, %v1093_v36  ;;  %v2257_v7 = vpack.c.bf16 %v50_v4, %v49_v2  ;;  %v1882_v53 = vrot.slane %v2500_v41, %v1881_v51 }
 0x38c   :  { %2256 = vmatpush3.bf16.msra.mxu0 %v2253_v0 }
 0x38d   :  { %2160 = vmatmul.mubr.msk.f32.vlgmr.msra.gmra.mrb[22].mxu1 %vm420_vm4, %v1095_v54  ;;  %2258 = vmatprep.subr.bf16.mxu0 %v2257_v7 }
 0x390   :  { %2260 = vmatpush3.bf16.msra.mxu0 %v2257_v7 }
 0x3fb   :  { %v1165_v55 = vpop.f32.mrb[12].mxu1 }
 0x3fc   :  { %1169 = vst.msk [vmem:[#allocation3] sm:$0xff] %vm340_vm2, %v1165_v55  ;;  %v2112_v56 = vpop.f32.mrb[13].mxu1 }
 0x3ff   :  { %v1239_v57 = vpop.f32.mrb[14].mxu1 }
 0x400   :  { %1243 = vst.msk [vmem:[#allocation3 + $0x8] sm:$0xff] %vm340_vm2, %v1239_v57  ;;  %v2119_v58 = vpop.f32.mrb[15].mxu1 }
 0x44c   :  { %v1321_v59 = vpop.f32.mrb[16].mxu1 }
 0x44d   :  { %1326 = vrot.lane.b32.xlu0 %v1321_v59, %s2372_s13  ;;  %v2126_v37 = vpop.f32.mrb[17].mxu1 }
 0x450   :  { %v1408_v60 = vpop.f32.mrb[18].mxu1 }
 0x451   :  { %1413 = vrot.lane.b32.xlu1 %v1408_v60, %s2372_s13  ;;  %v2133_v61 = vpop.f32.mrb[19].mxu1 }
 0x454   :  { %v1492_v1 = vpop.f32.mrb[14].mxu0 }
 0x455   :  { %v2140_v6 = vpop.f32.mrb[15].mxu0  ;;  %1497 = vrot.lane.b32.xlu0 %v1492_v1, %s2373_s22 }
 0x458   :  { %v1577_v8 = vpop.f32.mrb[20].mxu1 }
 0x459   :  { %1582 = vrot.lane.b32.xlu1 %v1577_v8, %s2373_s22  ;;  %v2147_v9 = vpop.f32.mrb[21].mxu1 }
 0x45e   :  { %v1661_v10 = vpop.f32.mrb[16].mxu0 }
 0x45f   :  { %v2154_v11 = vpop.f32.mrb[17].mxu0  ;;  %1666 = vrot.lane.b32.xlu0 %v1661_v10, %s2374_s23 }
 0x460   :  { %v1746_v12 = vpop.f32.mrb[22].mxu1 }
 0x461   :  { %1751 = vrot.lane.b32.xlu1 %v1746_v12, %s2374_s23  ;;  %v2161_v13 = vpop.f32.mrb[23].mxu1 }
 0x4bf   :  { %v1327_v14 = vpop.permute.xlu0 %1326 }
 0x4c0   :  { %1330 = vst.msk [vmem:[#allocation3] sm:$0xff] %vm1329_vm5, %v1327_v14 }
 0x4c3   :  { %v1414_v15 = vpop.permute.xlu1 %1413 }
 0x4c4   :  { %1416 = vst.msk [vmem:[#allocation3 + $0x8] sm:$0xff] %vm1329_vm5, %v1414_v15 }
 0x4c7   :  { %v1498_v16 = vpop.permute.xlu0 %1497 }
 0x4c8   :  { %1501 = vst.msk [vmem:[#allocation3] sm:$0xff] %vm1500_vm6, %v1498_v16 }
 0x4cb   :  { %v1583_v19 = vpop.permute.xlu1 %1582 }
 0x4cc   :  { %1585 = vst.msk [vmem:[#allocation3 + $0x8] sm:$0xff] %vm1500_vm6, %v1583_v19 }
 0x4d1   :  { %v1667_v45 = vpop.permute.xlu0 %1666 }
 0x4d2   :  { %1670 = vst.msk [vmem:[#allocation3] sm:$0xff] %vm1669_vm7, %v1667_v45 }
 0x4d3   :  { %v1752_v17 = vpop.permute.xlu1 %1751 }
 0x4d4   :  { %1754 = vst.msk [vmem:[#allocation3 + $0x8] sm:$0xff] %vm1669_vm7, %v1752_v17 }
 0x4d9   :  { %v1755_v20 = vld [vmem:[#allocation3] sm:$0xff] }
 0x4da   :  { %2170 = vmatprep.mubr.msk.f32.mxu0 %vm56_vm0, %v1755_v20 }
 0x4db   :  { %v1756_v3 = vld [vmem:[#allocation3 + $0x8] sm:$0xff] }
 0x4dc   :  { %2171 = vmatmul.mubr.msk.f32.vlgmr.msra.gmra.mrb[18].mxu0 %vm56_vm0, %v1756_v3 }
 0x5af   :  { %v2172_v21 = vpop.f32.mrb[18].mxu0 }
 0x5b0   :  { %v1839_v22 = vadd.f32 %v2172_v21, %v2458_v24  ;;  %v1829_v23 = vpop.f32.mrb[19].mxu0 }
 0x5b1   :  { %v1838_v25 = vadd.f32 %v1829_v23, %v2446_v18 }
 0x5b2   :  { %v1845_v26 = vadd.f32 %v1843_v46, %v1839_v22 }
 0x5b3   :  { %v1844_v27 = vadd.f32 %v1843_v46, %v1838_v25 }
 0x5b4   :  { %v1849_v28 = vsel %vm56_vm0, %v1845_v26, 0.0 }
 0x5b5   :  { %1850 = vadd.xlane.f32.xlu1 %v1849_v28  ;;  %v1846_v29 = vsel %vm56_vm0, %v1844_v27, 0.0 }
 0x5b6   :  { %1847 = vadd.xlane.f32.xlu0 %v1846_v29 }
 0x642   :  { %v1851_v30 = vpop.xlane.xlu1 %1850 }
 0x643   :  { %v1854_v31 = vmul.f32 0.03125, %v1851_v30  ;;  %v1848_v32 = vpop.xlane.xlu0 %1847 }
 0x644   :  { %v1853_v33 = vmul.f32 0.03125, %v1848_v32 }
 0x645   :  { %v1856_v34 = vsub.f32 %v1845_v26, %v1854_v31 }
 0x646   :  { %v1855_v35 = vsub.f32 %v1844_v27, %v1853_v33 }
 0x647   :  { %v1858_v40 = vmul.f32 %v1856_v34, %v1856_v34 }
 0x648   :  { %v1857_v38 = vmul.f32 %v1855_v35, %v1855_v35 }
 0x649   :  { %v1862_v18 = vsel %vm56_vm0, %v1858_v40, 0.0 }
 0x64a   :  { %v1859_v24 = vsel %vm56_vm0, %v1857_v38, 0.0 }
 0x64b   :  { %1860 = vadd.xlane.f32.xlu0 %v1859_v24 }
 0x64f   :  { %1863 = vadd.xlane.f32.xlu0 %v1862_v18 }
 0x6d8   :  { %v1861_v42 = vpop.xlane.xlu0 %1860 }
 0x6d9   :  { %v1865_v43 = vmul.f32 0.03125, %v1861_v42 }
 0x6db   :  { %v1867_v44 = vadd.f32 1e-05, %v1865_v43 }
 0x6dc   :  { %v1864_v47 = vpop.xlane.xlu0 %1863 }
 0x6dd   :  { %2362 = vrsqrt.f32 %v1867_v44  ;;  %v1866_v48 = vmul.f32 0.03125, %v1864_v47 }
 0x6df   :  { %v1868_v49 = vadd.f32 1e-05, %v1866_v48 }
 0x6e1   :  { %2364 = vrsqrt.f32 %v1868_v49 }
 0x6e7   :  { %v2363_v36 = vpop.eup %2362 }
 0x6e8   :  { %v1871_v54 = vmul.f32 %v2363_v36, %v1855_v35 }
 0x6ea   :  { %v1877_v55 = vmul.f32 %v1876_v52, %v1871_v54 }
 0x6eb   :  { %v2365_v56 = vpop.eup %2364 }
 0x6ec   :  { %v1883_v57 = vadd.f32 %v1882_v53, %v1877_v55  ;;  %v1872_v58 = vmul.f32 %v2365_v56, %v1856_v34 }
 0x6ee   :  { %1885 = vst.msk [vmem:[%s2726_s4] sm:$0xff] %vm56_vm0, %v1883_v57  ;;  %v1878_v59 = vmul.f32 %v1876_v52, %v1872_v58 }
 0x6f0   :  { %v1884_v37 = vadd.f32 %v1882_v53, %v1878_v59 }
 0x6f2   :  { %1886 = vst.msk [vmem:[%s2726_s4 + $0x8] sm:$0xff] %vm56_vm0, %v1884_v37 }

</bundles_post_ra>
